<compile_context>
chip_gen: v7x
topology: tpu7x:2x2x1
jax: 0.10.0
libtpu: 0.0.40
codegen_flags: <defaults>
</compile_context>

<pallas_src>
import functools

import jax
import jax.numpy as jnp
from jax import lax
from jax.experimental import pallas as pl
from jax.experimental.pallas import tpu as pltpu

EPS = 1e-5
CP = 8          # channels padded to one full sublane group
KTAPS = 10 * CP  # 9 conv taps + 1 all-ones (bias) group, each 8 rows


def _resnet_block_kernel(x_ref, w1_ref, w2_ref, out_ref, *, N, H, W):
    # x_ref  : (Cp, N*H*W)  channel-major, batch folded onto the lane axis
    # w{1,2} : (Cp, 80)     packed weights [cout, 8*tap + cin], bias in col 72
    # out_ref: (Cp, N*H*W)
    Cp, L = x_ref.shape
    HW = H * W
    inv_n = 1.0 / float(HW)

    x = x_ref[...]                                     # (Cp, L) f32

    # Boundary masks (per image), hoisted once and shared by both convs.
    lane = lax.broadcasted_iota(jnp.int32, (Cp, L), 1)
    col = lane % W                                     # column inside a row
    pos = lane % HW                                    # position inside an image
    m_left = col == 0                                  # col 0    -> reflect to col 1
    m_right = col == W - 1                             # col W-1  -> reflect to col W-2
    m_top = pos < W                                    # row 0    -> reflect to row 1
    m_bot = pos >= (H - 1) * W                         # row H-1  -> reflect to row H-2

    # All-ones tap group: carries the conv bias through the matmul.
    ones_g = jnp.ones((Cp, L), jnp.float32)

    def conv3x3_reflect(a, w):
        # conv3x3(reflect_pad_1(a)) + bias ; a: (Cp, L) -> (Cp, L) f32.
        # Column neighbours via lane rolls, reflection fixed up at W boundaries.
        a_m1 = pltpu.roll(a, shift=1, axis=1)          # column w-1
        a_p1 = pltpu.roll(a, shift=L - 1, axis=1)      # column w+1
        cols = (jnp.where(m_left, a_p1, a_m1),         # dx = 0 (reflected at w=0)
                a,                                     # dx = 1
                jnp.where(m_right, a_m1, a_p1))        # dx = 2 (reflected at w=W-1)
        # Row neighbours via whole-row rolls; reflection fixed up at rows 0/H-1.
        rows0, rows1, rows2 = [], [], []
        for c in cols:
            c_up = pltpu.roll(c, shift=W, axis=1)      # row h-1
            c_dn = pltpu.roll(c, shift=L - W, axis=1)  # row h+1
            rows0.append(jnp.where(m_top, c_dn, c_up))     # dy = 0
            rows1.append(c)                                # dy = 1
            rows2.append(jnp.where(m_bot, c_up, c_dn))     # dy = 2
        # im2col as a register value: 10 sublane-aligned (8, L) groups,
        # ordered tap = dy*3 + dx, plus the ones/bias group.  No VMEM scratch.
        taps = jnp.concatenate(rows0 + rows1 + rows2 + [ones_g], axis=0)  # (80, L)
        # Single MXU matmul per conv; bias absorbed via the ones group.
        return jnp.dot(w, taps, preferred_element_type=jnp.float32)

    def instance_norm(y):
        # Per-channel stats over each image's HW-lane segment (lane-tile aligned
        # static slices), single fused pass.  Zero-padded channels give
        # mean=var=0 and stay exactly zero.
        segs = []
        for n in range(N):
            yn = y[:, n * HW:(n + 1) * HW]
            mean = jnp.sum(yn, axis=1, keepdims=True) * inv_n
            var = jnp.sum(yn * yn, axis=1, keepdims=True) * inv_n - mean * mean
            var = jnp.maximum(var, 0.0)
            segs.append((yn - mean) * lax.rsqrt(var + EPS))
        return segs[0] if N == 1 else jnp.concatenate(segs, axis=1)

    y1 = jnp.maximum(instance_norm(conv3x3_reflect(x, w1_ref[...])), 0.0)
    y2 = instance_norm(conv3x3_reflect(y1, w2_ref[...]))
    out_ref[...] = (x + y2).astype(out_ref.dtype)


def _pack_conv_weight(w, b):
    """(3,3,C,C) HWIO + (C,) bias -> (Cp, 80), layout [cout, 8*tap + cin].

    tap = ky*3 + kx for the 9 conv taps; tap 9 is the all-ones group and its
    first column (index 72) carries the bias.  All padded entries are zero.
    """
    C = w.shape[2]
    assert C <= CP
    w9 = jnp.transpose(w.reshape(9, C, C), (2, 0, 1))         # (cout, tap, cin)
    wp = jnp.zeros((CP, 10, CP), jnp.float32)
    wp = wp.at[:C, :9, :C].set(w9)
    wp = wp.at[:C, 9, 0].set(b)                               # bias column (72)
    return wp.reshape(CP, KTAPS)


def resnet_block_pallas(x_nchw, w1, b1, w2, b2):
    """ResnetBlock forward. x_nchw: (N,C,H,W) f32, w: (3,3,C,C) HWIO, b: (C,)."""
    N, C, H, W = x_nchw.shape
    assert H >= 2 and W >= 2, "reflect pad of 1 needs H,W >= 2"
    assert C <= CP
    HW = H * W
    L = N * HW

    # Layout plumbing only (host-side): pad channels to 8 sublanes and fold the
    # batch onto the lane axis -> (Cp, N*H*W).  No padded spatial copy in HBM.
    xp = jnp.zeros((N, CP, H, W), jnp.float32).at[:, :C].set(x_nchw)
    x_fold = jnp.transpose(xp, (1, 0, 2, 3)).reshape(CP, L)

    w1p = _pack_conv_weight(w1, b1)
    w2p = _pack_conv_weight(w2, b2)

    kernel = functools.partial(_resnet_block_kernel, N=N, H=H, W=W)

    flops = 2 * 2 * CP * KTAPS * L                     # two im2col matmuls
    bytes_accessed = 2 * CP * L * 4 + 2 * CP * KTAPS * 4

    out_fold = pl.pallas_call(
        kernel,
        out_shape=jax.ShapeDtypeStruct((CP, L), jnp.float32),
        grid_spec=pltpu.PrefetchScalarGridSpec(
            num_scalar_prefetch=0,
            grid=(1,),                                 # whole batch in one step
            in_specs=[
                pl.BlockSpec((CP, L), lambda i: (0, 0)),
                pl.BlockSpec((CP, KTAPS), lambda i: (0, 0)),
                pl.BlockSpec((CP, KTAPS), lambda i: (0, 0)),
            ],
            out_specs=pl.BlockSpec((CP, L), lambda i: (0, 0)),
        ),
        compiler_params=pltpu.CompilerParams(
            dimension_semantics=("arbitrary",)),
        cost_estimate=pl.CostEstimate(
            flops=flops, transcendentals=4 * N * CP,
            bytes_accessed=bytes_accessed),
    )(x_fold, w1p, w2p)

    out = out_fold.reshape(CP, N, H, W).transpose(1, 0, 2, 3)[:, :C]
    return out.astype(x_nchw.dtype)


def resnet_block_ref(x_nchw, w1, b1, w2, b2):
    """Pure-JAX reference (same semantics as the PyTorch module), NCHW."""
    dn = ("NCHW", "HWIO", "NCHW")
    C = x_nchw.shape[1]

    def block(a, w, b):
        ap = jnp.pad(a, ((0, 0), (0, 0), (1, 1), (1, 1)), mode="reflect")
        y = lax.conv_general_dilated(ap, w, (1, 1), "VALID",
                                     dimension_numbers=dn)
        y = y + b.reshape(1, C, 1, 1)
        mean = y.mean(axis=(2, 3), keepdims=True)
        var = ((y - mean) ** 2).mean(axis=(2, 3), keepdims=True)
        return (y - mean) * lax.rsqrt(var + EPS)

    y = jnp.maximum(block(x_nchw, w1, b1), 0.0)
    z = block(y, w2, b2)
    return x_nchw + z


if __name__ == "__main__":
    N, C, H, W = 2, 4, 16, 16  # dim = 4

    key = jax.random.PRNGKey(0)
    kx, kw1, kb1, kw2, kb2 = jax.random.split(key, 5)

    # PyTorch-style NCHW input (the module's native layout).
    x = jax.random.normal(kx, (N, C, H, W), dtype=jnp.float32)

    # Conv parameters (kernel_size=3, in=out=dim, bias=True), HWIO layout.
    scale = 1.0 / jnp.sqrt(9.0 * C)
    w1 = jax.random.normal(kw1, (3, 3, C, C), dtype=jnp.float32) * scale
    b1 = jax.random.normal(kb1, (C,), dtype=jnp.float32) * scale
    w2 = jax.random.normal(kw2, (3, 3, C, C), dtype=jnp.float32) * scale
    b2 = jax.random.normal(kb2, (C,), dtype=jnp.float32) * scale

    out = resnet_block_pallas(x, w1, b1, w2, b2)
    out = jax.block_until_ready(out)

    ref = resnet_block_ref(x, w1, b1, w2, b2)
    err = float(jnp.max(jnp.abs(out - ref)))
    assert jnp.allclose(out, ref, atol=2e-4, rtol=2e-4), (
        f"mismatch vs reference (max abs err {err:.3e})")

    print("KERNEL_OK")
</pallas_src>

<mosaic_0001>
module attributes {stable_mosaic.version = 11 : i64} {
  func.func @_resnet_block_kernel(%arg0: i32, %arg1: memref<8x512xf32, #tpu.memory_space<vmem>>, %arg2: memref<8x80xf32, #tpu.memory_space<vmem>>, %arg3: memref<8x80xf32, #tpu.memory_space<vmem>>, %arg4: memref<8x512xf32, #tpu.memory_space<vmem>>) attributes {dimension_semantics = [#tpu.dimension_semantics<arbitrary>], iteration_bounds = array<i64: 1>, scalar_prefetch = 0 : i64, scratch_operands = 0 : i64, tpu.core_type = #tpu.core_type<tc>, window_params = [{pipeline_mode = #tpu.pipeline_mode<synchronous>, transform_indices = @transform_0, window_bounds = array<i64: 8, 512>}, {pipeline_mode = #tpu.pipeline_mode<synchronous>, transform_indices = @transform_1, window_bounds = array<i64: 8, 80>}, {pipeline_mode = #tpu.pipeline_mode<synchronous>, transform_indices = @transform_2, window_bounds = array<i64: 8, 80>}, {pipeline_mode = #tpu.pipeline_mode<synchronous>, transform_indices = @transform_3, window_bounds = array<i64: 8, 512>}]} {
    %c0 = arith.constant 0 : index
    %c0_0 = arith.constant 0 : index
    %0 = vector.load %arg1[%c0, %c0_0] : memref<8x512xf32, #tpu.memory_space<vmem>>, vector<8x512xf32>
    %1 = tpu.iota {dimensions = array<i32: 1>} : vector<8x512xi32>
    %c16_i32 = arith.constant 16 : i32
    %c0_i32 = arith.constant 0 : i32
    %2 = arith.cmpi eq, %c16_i32, %c0_i32 : i32
    %c1_i32 = arith.constant 1 : i32
    %3 = arith.select %2, %c1_i32, %c16_i32 : i32
    %4 = vector.broadcast %3 : i32 to vector<8x512xi32>
    %5 = arith.remsi %1, %4 : vector<8x512xi32>
    %c0_i32_1 = arith.constant 0 : i32
    %6 = vector.broadcast %c0_i32_1 : i32 to vector<8x512xi32>
    %7 = arith.cmpi ne, %5, %6 : vector<8x512xi32>
    %c0_i32_2 = arith.constant 0 : i32
    %8 = vector.broadcast %c0_i32_2 : i32 to vector<8x512xi32>
    %9 = arith.cmpi slt, %5, %8 : vector<8x512xi32>
    %c0_i32_3 = arith.constant 0 : i32
    %10 = arith.cmpi slt, %3, %c0_i32_3 : i32
    %11 = vector.broadcast %10 : i1 to vector<8x512xi1>
    %12 = vector.broadcast %11 : vector<8x512xi1> to vector<8x512xi1>
    %13 = arith.xori %9, %12 : vector<8x512xi1>
    %14 = arith.andi %13, %7 : vector<8x512xi1>
    %15 = vector.broadcast %3 : i32 to vector<8x512xi32>
    %16 = arith.addi %5, %15 : vector<8x512xi32>
    %17 = arith.select %14, %16, %5 : vector<8x512xi1>, vector<8x512xi32>
    %c256_i32 = arith.constant 256 : i32
    %c0_i32_4 = arith.constant 0 : i32
    %18 = arith.cmpi eq, %c256_i32, %c0_i32_4 : i32
    %c1_i32_5 = arith.constant 1 : i32
    %19 = arith.select %18, %c1_i32_5, %c256_i32 : i32
    %20 = vector.broadcast %19 : i32 to vector<8x512xi32>
    %21 = arith.remsi %1, %20 : vector<8x512xi32>
    %c0_i32_6 = arith.constant 0 : i32
    %22 = vector.broadcast %c0_i32_6 : i32 to vector<8x512xi32>
    %23 = arith.cmpi ne, %21, %22 : vector<8x512xi32>
    %c0_i32_7 = arith.constant 0 : i32
    %24 = vector.broadcast %c0_i32_7 : i32 to vector<8x512xi32>
    %25 = arith.cmpi slt, %21, %24 : vector<8x512xi32>
    %c0_i32_8 = arith.constant 0 : i32
    %26 = arith.cmpi slt, %19, %c0_i32_8 : i32
    %27 = vector.broadcast %26 : i1 to vector<8x512xi1>
    %28 = vector.broadcast %27 : vector<8x512xi1> to vector<8x512xi1>
    %29 = arith.xori %25, %28 : vector<8x512xi1>
    %30 = arith.andi %29, %23 : vector<8x512xi1>
    %31 = vector.broadcast %19 : i32 to vector<8x512xi32>
    %32 = arith.addi %21, %31 : vector<8x512xi32>
    %33 = arith.select %30, %32, %21 : vector<8x512xi1>, vector<8x512xi32>
    %c0_i32_9 = arith.constant 0 : i32
    %34 = vector.broadcast %c0_i32_9 : i32 to vector<8x512xi32>
    %35 = arith.cmpi eq, %17, %34 : vector<8x512xi32>
    %c15_i32 = arith.constant 15 : i32
    %36 = vector.broadcast %c15_i32 : i32 to vector<8x512xi32>
    %37 = arith.cmpi eq, %17, %36 : vector<8x512xi32>
    %c16_i32_10 = arith.constant 16 : i32
    %38 = vector.broadcast %c16_i32_10 : i32 to vector<8x512xi32>
    %39 = arith.cmpi slt, %33, %38 : vector<8x512xi32>
    %c240_i32 = arith.constant 240 : i32
    %40 = vector.broadcast %c240_i32 : i32 to vector<8x512xi32>
    %41 = arith.cmpi sge, %33, %40 : vector<8x512xi32>
    %cst = arith.constant 1.000000e+00 : f32
    %42 = vector.broadcast %cst : f32 to vector<8x512xf32>
    %c0_11 = arith.constant 0 : index
    %c0_12 = arith.constant 0 : index
    %43 = vector.load %arg2[%c0_11, %c0_12] : memref<8x80xf32, #tpu.memory_space<vmem>>, vector<8x80xf32>
    %c1_i32_13 = arith.constant 1 : i32
    %44 = tpu.dynamic_rotate %0 by %c1_i32_13 dim 1 : vector<8x512xf32>, i32 -> vector<8x512xf32>
    %c511_i32 = arith.constant 511 : i32
    %45 = tpu.dynamic_rotate %0 by %c511_i32 dim 1 : vector<8x512xf32>, i32 -> vector<8x512xf32>
    %46 = arith.select %35, %45, %44 : vector<8x512xi1>, vector<8x512xf32>
    %47 = arith.select %37, %44, %45 : vector<8x512xi1>, vector<8x512xf32>
    %c16_i32_14 = arith.constant 16 : i32
    %48 = tpu.dynamic_rotate %46 by %c16_i32_14 dim 1 : vector<8x512xf32>, i32 -> vector<8x512xf32>
    %c496_i32 = arith.constant 496 : i32
    %49 = tpu.dynamic_rotate %46 by %c496_i32 dim 1 : vector<8x512xf32>, i32 -> vector<8x512xf32>
    %50 = arith.select %39, %49, %48 : vector<8x512xi1>, vector<8x512xf32>
    %51 = arith.select %41, %48, %49 : vector<8x512xi1>, vector<8x512xf32>
    %c16_i32_15 = arith.constant 16 : i32
    %52 = tpu.dynamic_rotate %0 by %c16_i32_15 dim 1 : vector<8x512xf32>, i32 -> vector<8x512xf32>
    %c496_i32_16 = arith.constant 496 : i32
    %53 = tpu.dynamic_rotate %0 by %c496_i32_16 dim 1 : vector<8x512xf32>, i32 -> vector<8x512xf32>
    %54 = arith.select %39, %53, %52 : vector<8x512xi1>, vector<8x512xf32>
    %55 = arith.select %41, %52, %53 : vector<8x512xi1>, vector<8x512xf32>
    %c16_i32_17 = arith.constant 16 : i32
    %56 = tpu.dynamic_rotate %47 by %c16_i32_17 dim 1 : vector<8x512xf32>, i32 -> vector<8x512xf32>
    %c496_i32_18 = arith.constant 496 : i32
    %57 = tpu.dynamic_rotate %47 by %c496_i32_18 dim 1 : vector<8x512xf32>, i32 -> vector<8x512xf32>
    %58 = arith.select %39, %57, %56 : vector<8x512xi1>, vector<8x512xf32>
    %59 = arith.select %41, %56, %57 : vector<8x512xi1>, vector<8x512xf32>
    %60 = tpu.concatenate %50, %54, %58, %46, %0, %47, %51, %55, %59, %42 in 0 : vector<8x512xf32>, vector<8x512xf32>, vector<8x512xf32>, vector<8x512xf32>, vector<8x512xf32>, vector<8x512xf32>, vector<8x512xf32>, vector<8x512xf32>, vector<8x512xf32>, vector<8x512xf32> -> vector<80x512xf32>
    %cst_19 = arith.constant dense<0.000000e+00> : vector<8x512xf32>
    %61 = tpu.matmul %43, %60, %cst_19 {dimension_numbers = #tpu.dot_dimension_numbers<[1], [0], [0], [1], [0, 0, 1, 1], [], []>} : vector<8x80xf32>, vector<80x512xf32>, vector<8x512xf32> -> vector<8x512xf32>
    %62 = vector.extract_strided_slice %61 {offsets = [0, 0], sizes = [8, 256], strides = [1, 1]} : vector<8x512xf32> to vector<8x256xf32>
    %cst_20 = arith.constant dense<0.000000e+00> : vector<8xf32>
    %63 = vector.multi_reduction <add>, %62, %cst_20 [1] : vector<8x256xf32> to vector<8xf32>
    %64 = vector.shape_cast %63 : vector<8xf32> to vector<8x1xf32>
    %cst_21 = arith.constant 3.906250e-03 : f32
    %65 = vector.broadcast %cst_21 : f32 to vector<8x1xf32>
    %66 = arith.mulf %64, %65 : vector<8x1xf32>
    %67 = arith.mulf %62, %62 : vector<8x256xf32>
    %cst_22 = arith.constant dense<0.000000e+00> : vector<8xf32>
    %68 = vector.multi_reduction <add>, %67, %cst_22 [1] : vector<8x256xf32> to vector<8xf32>
    %69 = vector.shape_cast %68 : vector<8xf32> to vector<8x1xf32>
    %cst_23 = arith.constant 3.906250e-03 : f32
    %70 = vector.broadcast %cst_23 : f32 to vector<8x1xf32>
    %71 = arith.mulf %69, %70 : vector<8x1xf32>
    %72 = arith.mulf %66, %66 : vector<8x1xf32>
    %73 = arith.subf %71, %72 : vector<8x1xf32>
    %cst_24 = arith.constant 0.000000e+00 : f32
    %74 = vector.broadcast %cst_24 : f32 to vector<8x1xf32>
    %75 = arith.maximumf %73, %74 : vector<8x1xf32>
    %76 = vector.broadcast %66 : vector<8x1xf32> to vector<8x256xf32>
    %77 = arith.subf %62, %76 : vector<8x256xf32>
    %cst_25 = arith.constant 9.99999974E-6 : f32
    %78 = vector.broadcast %cst_25 : f32 to vector<8x1xf32>
    %79 = arith.addf %75, %78 : vector<8x1xf32>
    %80 = math.rsqrt %79 : vector<8x1xf32>
    %81 = vector.broadcast %80 : vector<8x1xf32> to vector<8x256xf32>
    %82 = arith.mulf %77, %81 : vector<8x256xf32>
    %83 = vector.extract_strided_slice %61 {offsets = [0, 256], sizes = [8, 256], strides = [1, 1]} : vector<8x512xf32> to vector<8x256xf32>
    %cst_26 = arith.constant dense<0.000000e+00> : vector<8xf32>
    %84 = vector.multi_reduction <add>, %83, %cst_26 [1] : vector<8x256xf32> to vector<8xf32>
    %85 = vector.shape_cast %84 : vector<8xf32> to vector<8x1xf32>
    %cst_27 = arith.constant 3.906250e-03 : f32
    %86 = vector.broadcast %cst_27 : f32 to vector<8x1xf32>
    %87 = arith.mulf %85, %86 : vector<8x1xf32>
    %88 = arith.mulf %83, %83 : vector<8x256xf32>
    %cst_28 = arith.constant dense<0.000000e+00> : vector<8xf32>
    %89 = vector.multi_reduction <add>, %88, %cst_28 [1] : vector<8x256xf32> to vector<8xf32>
    %90 = vector.shape_cast %89 : vector<8xf32> to vector<8x1xf32>
    %cst_29 = arith.constant 3.906250e-03 : f32
    %91 = vector.broadcast %cst_29 : f32 to vector<8x1xf32>
    %92 = arith.mulf %90, %91 : vector<8x1xf32>
    %93 = arith.mulf %87, %87 : vector<8x1xf32>
    %94 = arith.subf %92, %93 : vector<8x1xf32>
    %cst_30 = arith.constant 0.000000e+00 : f32
    %95 = vector.broadcast %cst_30 : f32 to vector<8x1xf32>
    %96 = arith.maximumf %94, %95 : vector<8x1xf32>
    %97 = vector.broadcast %87 : vector<8x1xf32> to vector<8x256xf32>
    %98 = arith.subf %83, %97 : vector<8x256xf32>
    %cst_31 = arith.constant 9.99999974E-6 : f32
    %99 = vector.broadcast %cst_31 : f32 to vector<8x1xf32>
    %100 = arith.addf %96, %99 : vector<8x1xf32>
    %101 = math.rsqrt %100 : vector<8x1xf32>
    %102 = vector.broadcast %101 : vector<8x1xf32> to vector<8x256xf32>
    %103 = arith.mulf %98, %102 : vector<8x256xf32>
    %104 = tpu.concatenate %82, %103 in 1 : vector<8x256xf32>, vector<8x256xf32> -> vector<8x512xf32>
    %cst_32 = arith.constant 0.000000e+00 : f32
    %105 = vector.broadcast %cst_32 : f32 to vector<8x512xf32>
    %106 = arith.maximumf %104, %105 : vector<8x512xf32>
    %c0_33 = arith.constant 0 : index
    %c0_34 = arith.constant 0 : index
    %107 = vector.load %arg3[%c0_33, %c0_34] : memref<8x80xf32, #tpu.memory_space<vmem>>, vector<8x80xf32>
    %c1_i32_35 = arith.constant 1 : i32
    %108 = tpu.dynamic_rotate %106 by %c1_i32_35 dim 1 : vector<8x512xf32>, i32 -> vector<8x512xf32>
    %c511_i32_36 = arith.constant 511 : i32
    %109 = tpu.dynamic_rotate %106 by %c511_i32_36 dim 1 : vector<8x512xf32>, i32 -> vector<8x512xf32>
    %110 = arith.select %35, %109, %108 : vector<8x512xi1>, vector<8x512xf32>
    %111 = arith.select %37, %108, %109 : vector<8x512xi1>, vector<8x512xf32>
    %c16_i32_37 = arith.constant 16 : i32
    %112 = tpu.dynamic_rotate %110 by %c16_i32_37 dim 1 : vector<8x512xf32>, i32 -> vector<8x512xf32>
    %c496_i32_38 = arith.constant 496 : i32
    %113 = tpu.dynamic_rotate %110 by %c496_i32_38 dim 1 : vector<8x512xf32>, i32 -> vector<8x512xf32>
    %114 = arith.select %39, %113, %112 : vector<8x512xi1>, vector<8x512xf32>
    %115 = arith.select %41, %112, %113 : vector<8x512xi1>, vector<8x512xf32>
    %c16_i32_39 = arith.constant 16 : i32
    %116 = tpu.dynamic_rotate %106 by %c16_i32_39 dim 1 : vector<8x512xf32>, i32 -> vector<8x512xf32>
    %c496_i32_40 = arith.constant 496 : i32
    %117 = tpu.dynamic_rotate %106 by %c496_i32_40 dim 1 : vector<8x512xf32>, i32 -> vector<8x512xf32>
    %118 = arith.select %39, %117, %116 : vector<8x512xi1>, vector<8x512xf32>
    %119 = arith.select %41, %116, %117 : vector<8x512xi1>, vector<8x512xf32>
    %c16_i32_41 = arith.constant 16 : i32
    %120 = tpu.dynamic_rotate %111 by %c16_i32_41 dim 1 : vector<8x512xf32>, i32 -> vector<8x512xf32>
    %c496_i32_42 = arith.constant 496 : i32
    %121 = tpu.dynamic_rotate %111 by %c496_i32_42 dim 1 : vector<8x512xf32>, i32 -> vector<8x512xf32>
    %122 = arith.select %39, %121, %120 : vector<8x512xi1>, vector<8x512xf32>
    %123 = arith.select %41, %120, %121 : vector<8x512xi1>, vector<8x512xf32>
    %124 = tpu.concatenate %114, %118, %122, %110, %106, %111, %115, %119, %123, %42 in 0 : vector<8x512xf32>, vector<8x512xf32>, vector<8x512xf32>, vector<8x512xf32>, vector<8x512xf32>, vector<8x512xf32>, vector<8x512xf32>, vector<8x512xf32>, vector<8x512xf32>, vector<8x512xf32> -> vector<80x512xf32>
    %cst_43 = arith.constant dense<0.000000e+00> : vector<8x512xf32>
    %125 = tpu.matmul %107, %124, %cst_43 {dimension_numbers = #tpu.dot_dimension_numbers<[1], [0], [0], [1], [0, 0, 1, 1], [], []>} : vector<8x80xf32>, vector<80x512xf32>, vector<8x512xf32> -> vector<8x512xf32>
    %126 = vector.extract_strided_slice %125 {offsets = [0, 0], sizes = [8, 256], strides = [1, 1]} : vector<8x512xf32> to vector<8x256xf32>
    %cst_44 = arith.constant dense<0.000000e+00> : vector<8xf32>
    %127 = vector.multi_reduction <add>, %126, %cst_44 [1] : vector<8x256xf32> to vector<8xf32>
    %128 = vector.shape_cast %127 : vector<8xf32> to vector<8x1xf32>
    %cst_45 = arith.constant 3.906250e-03 : f32
    %129 = vector.broadcast %cst_45 : f32 to vector<8x1xf32>
    %130 = arith.mulf %128, %129 : vector<8x1xf32>
    %131 = arith.mulf %126, %126 : vector<8x256xf32>
    %cst_46 = arith.constant dense<0.000000e+00> : vector<8xf32>
    %132 = vector.multi_reduction <add>, %131, %cst_46 [1] : vector<8x256xf32> to vector<8xf32>
    %133 = vector.shape_cast %132 : vector<8xf32> to vector<8x1xf32>
    %cst_47 = arith.constant 3.906250e-03 : f32
    %134 = vector.broadcast %cst_47 : f32 to vector<8x1xf32>
    %135 = arith.mulf %133, %134 : vector<8x1xf32>
    %136 = arith.mulf %130, %130 : vector<8x1xf32>
    %137 = arith.subf %135, %136 : vector<8x1xf32>
    %cst_48 = arith.constant 0.000000e+00 : f32
    %138 = vector.broadcast %cst_48 : f32 to vector<8x1xf32>
    %139 = arith.maximumf %137, %138 : vector<8x1xf32>
    %140 = vector.broadcast %130 : vector<8x1xf32> to vector<8x256xf32>
    %141 = arith.subf %126, %140 : vector<8x256xf32>
    %cst_49 = arith.constant 9.99999974E-6 : f32
    %142 = vector.broadcast %cst_49 : f32 to vector<8x1xf32>
    %143 = arith.addf %139, %142 : vector<8x1xf32>
    %144 = math.rsqrt %143 : vector<8x1xf32>
    %145 = vector.broadcast %144 : vector<8x1xf32> to vector<8x256xf32>
    %146 = arith.mulf %141, %145 : vector<8x256xf32>
    %147 = vector.extract_strided_slice %125 {offsets = [0, 256], sizes = [8, 256], strides = [1, 1]} : vector<8x512xf32> to vector<8x256xf32>
    %cst_50 = arith.constant dense<0.000000e+00> : vector<8xf32>
    %148 = vector.multi_reduction <add>, %147, %cst_50 [1] : vector<8x256xf32> to vector<8xf32>
    %149 = vector.shape_cast %148 : vector<8xf32> to vector<8x1xf32>
    %cst_51 = arith.constant 3.906250e-03 : f32
    %150 = vector.broadcast %cst_51 : f32 to vector<8x1xf32>
    %151 = arith.mulf %149, %150 : vector<8x1xf32>
    %152 = arith.mulf %147, %147 : vector<8x256xf32>
    %cst_52 = arith.constant dense<0.000000e+00> : vector<8xf32>
    %153 = vector.multi_reduction <add>, %152, %cst_52 [1] : vector<8x256xf32> to vector<8xf32>
    %154 = vector.shape_cast %153 : vector<8xf32> to vector<8x1xf32>
    %cst_53 = arith.constant 3.906250e-03 : f32
    %155 = vector.broadcast %cst_53 : f32 to vector<8x1xf32>
    %156 = arith.mulf %154, %155 : vector<8x1xf32>
    %157 = arith.mulf %151, %151 : vector<8x1xf32>
    %158 = arith.subf %156, %157 : vector<8x1xf32>
    %cst_54 = arith.constant 0.000000e+00 : f32
    %159 = vector.broadcast %cst_54 : f32 to vector<8x1xf32>
    %160 = arith.maximumf %158, %159 : vector<8x1xf32>
    %161 = vector.broadcast %151 : vector<8x1xf32> to vector<8x256xf32>
    %162 = arith.subf %147, %161 : vector<8x256xf32>
    %cst_55 = arith.constant 9.99999974E-6 : f32
    %163 = vector.broadcast %cst_55 : f32 to vector<8x1xf32>
    %164 = arith.addf %160, %163 : vector<8x1xf32>
    %165 = math.rsqrt %164 : vector<8x1xf32>
    %166 = vector.broadcast %165 : vector<8x1xf32> to vector<8x256xf32>
    %167 = arith.mulf %162, %166 : vector<8x256xf32>
    %168 = tpu.concatenate %146, %167 in 1 : vector<8x256xf32>, vector<8x256xf32> -> vector<8x512xf32>
    %169 = arith.addf %0, %168 : vector<8x512xf32>
    %c0_56 = arith.constant 0 : index
    %c0_57 = arith.constant 0 : index
    %170 = vector.load %arg4[%c0_56, %c0_57] : memref<8x512xf32, #tpu.memory_space<vmem>>, vector<8x512xf32>
    tpu.vector_store %arg4[%c0_56, %c0_57], %169 {strides = array<i32>} : memref<8x512xf32, #tpu.memory_space<vmem>>, vector<8x512xf32>,
    return
  }
  func.func @transform_0(%arg0: i32) -> (i32, i32) {
    %c0_i32 = arith.constant 0 : i32
    %c0_i32_0 = arith.constant 0 : i32
    %c0_i32_1 = arith.constant 0 : i32
    return %c0_i32, %c0_i32_0 : i32, i32
  }
  func.func @transform_1(%arg0: i32) -> (i32, i32) {
    %c0_i32 = arith.constant 0 : i32
    %c0_i32_0 = arith.constant 0 : i32
    %c0_i32_1 = arith.constant 0 : i32
    return %c0_i32, %c0_i32_0 : i32, i32
  }
  func.func @transform_2(%arg0: i32) -> (i32, i32) {
    %c0_i32 = arith.constant 0 : i32
    %c0_i32_0 = arith.constant 0 : i32
    %c0_i32_1 = arith.constant 0 : i32
    return %c0_i32, %c0_i32_0 : i32, i32
  }
  func.func @transform_3(%arg0: i32) -> (i32, i32) {
    %c0_i32 = arith.constant 0 : i32
    %c0_i32_0 = arith.constant 0 : i32
    %c0_i32_1 = arith.constant 0 : i32
    return %c0_i32, %c0_i32_0 : i32, i32
  }
}

</mosaic_0001>

<bundles_post_ra>
// kernel: tpu_custom_call.1
= control target key start
LH: loop header
LB: loop body
LE: loop exit
PB: predicated region body
PF: predicated region fallthrough
CT: control target
= control target key end

     0   :  { %8 = vsyncpa [#allocation3], 0  ;;  %s1813_s0 = inlined_call_operand.hbm [shape: f32[8,512], index: 0, kind: input, shape index: {}]   ;;  %s1814_s1 = inlined_call_operand.hbm [shape: f32[8,80], index: 1, kind: input, shape index: {}]   ;;  %s1815_s2 = inlined_call_operand.hbm [shape: f32[8,80], index: 2, kind: input, shape index: {}]   ;;  %s1816_s3 = inlined_call_operand.hbm [shape: f32[8,512], index: 3, kind: output, shape index: {}]  }
   0x1   :  { %9 = vsyncpa [#allocation6], 0 }
   0x2   :  { %10 = vsyncpa [#allocation4], 0  ;;  %s1184_s12 = smov [#allocation5]   ;;  %s1185_s14 = smov [#allocation2]  }
   0x3   :  { %s27_s13 = sshll.u32 %s1184_s12, 4  ;;  %s17_s15 = sshll.u32 %s1185_s14, 4  ;;  %s28_s13 = int_to_ptr.vmem [resolvable:$true] %s27_s13  ;;  %s18_s15 = int_to_ptr.vmem [resolvable:$true] %s17_s15 }
   0x4   :  { %s1090_s18 = scalar_lea.hbm %s1814_s1, 128 }
   0x5   :  { %p1091_p0 = scmp.ne.s32.totalorder %s1814_s1, %s1090_s18  ;;  %p1094_p1 = scmp.lt.u32.totalorder %s1090_s18, %s1814_s1 }
   0x7   :  { %p1096_p2 = pnand %p1094_p1, %p1091_p0 }
   0x9   :  { %1099 = shalt.err (!%p1096_p2)
}
   0xa   :  { %s1100_s23 = scalar_lea.vmem %s28_s13, 128  ;;  %p1105_p4 = scmp.lt.s32.totalorder %s28_s13, %s28_s13 }
   0xb   :  { %p1101_p3 = scmp.ne.s32.totalorder %s28_s13, %s1100_s23  ;;  %p1106_p5 = scmp.lt.s32.totalorder %s1100_s23, %s1100_s23 }
   0xd   :  { %p1107_p6 = por %p1106_p5, %p1105_p4 }
   0xf   :  { %p1108_p7 = pnand %p1107_p6, %p1101_p3 }
  0x11   :  { %1111 = shalt.err (!%p1108_p7)
}
  0x12   :  { %30 = dma.hbm_to_vmem [thread:$0]  %s1814_s1, 128, %s28_s13, [#allocation6]  }
  0x13   :  { %s1112_s28 = scalar_lea.hbm %s1813_s0, 512 }
  0x14   :  { %p1113_p8 = scmp.ne.s32.totalorder %s1813_s0, %s1112_s28  ;;  %p1116_p9 = scmp.lt.u32.totalorder %s1112_s28, %s1813_s0 }
  0x16   :  { %p1118_p10 = pnand %p1116_p9, %p1113_p8 }
  0x18   :  { %1121 = shalt.err (!%p1118_p10)
}
  0x19   :  { %s1122_s6 = scalar_lea.vmem %s18_s15, 512  ;;  %p1127_p12 = scmp.lt.s32.totalorder %s18_s15, %s18_s15 }
  0x1a   :  { %p1123_p11 = scmp.ne.s32.totalorder %s18_s15, %s1122_s6  ;;  %p1128_p13 = scmp.lt.s32.totalorder %s1122_s6, %s1122_s6 }
  0x1c   :  { %p1129_p0 = por %p1128_p13, %p1127_p12 }
  0x1e   :  { %p1130_p1 = pnand %p1129_p0, %p1123_p11 }
  0x20   :  { %1133 = shalt.err (!%p1130_p1)
}
  0x21   :  { %20 = dma.hbm_to_vmem [thread:$0]  %s1813_s0, 512, %s18_s15, [#allocation3]  }
  0x22   :  { %s1186_s8 = smov [#allocation7]   ;;  %s1134_s12 = scalar_lea.hbm %s1815_s2, 128 }
  0x23   :  { %s37_s9 = sshll.u32 %s1186_s8, 4  ;;  %p1135_p2 = scmp.ne.s32.totalorder %s1815_s2, %s1134_s12  ;;  %s38_s9 = int_to_ptr.vmem [resolvable:$true] %s37_s9 }
  0x24   :  { %p1138_p3 = scmp.lt.u32.totalorder %s1134_s12, %s1815_s2 }
  0x26   :  { %p1140_p4 = pnand %p1138_p3, %p1135_p2 }
  0x28   :  { %1143 = shalt.err (!%p1140_p4)
}
  0x29   :  { %s1144_s18 = scalar_lea.vmem %s38_s9, 128  ;;  %p1149_p6 = scmp.lt.s32.totalorder %s38_s9, %s38_s9 }
  0x2a   :  { %p1145_p5 = scmp.ne.s32.totalorder %s38_s9, %s1144_s18  ;;  %p1150_p7 = scmp.lt.s32.totalorder %s1144_s18, %s1144_s18 }
  0x2c   :  { %p1151_p8 = por %p1150_p7, %p1149_p6 }
  0x2e   :  { %p1152_p9 = pnand %p1151_p8, %p1145_p5 }
  0x30   :  { %1155 = shalt.err (!%p1152_p9)
}
  0x31   :  { %40 = dma.hbm_to_vmem [thread:$0]  %s1815_s2, 128, %s38_s9, [#allocation6]  }
  0x32   :  { %1178 = dma.done.wait [#allocation3], 512  }
  0x33   :  { %1179 = vsyncadd [#allocation3], 4294966784 }
  0x34   :  { %1180 = dma.done.wait [#allocation6], 256  }
  0x35   :  { %1181 = vsyncadd [#allocation6], 4294967040  ;;  %v1250_v0 = vld [vmem:[#allocation2] sm:$0xff]  ;;  %v1252_v1 = vld [vmem:[#allocation2 + $0x8] sm:$0xff]  ;;  %s1187_s19 = smov 127   ;;  %s1188_s20 = smov 1   ;;  %v54_v6 = vlaneseq }
  0x36   :  { %v1254_v2 = vld [vmem:[#allocation2 + $0x10] sm:$0xff]  ;;  %v932_v3 = vpack.i.bf16 %v1252_v1, %v1250_v0  ;;  %v1258_v4 = vld [vmem:[#allocation2 + $0x18] sm:$0xff]  ;;  %s1189_s2 = smov 16   ;;  %s1190_s21 = smov 112   ;;  %v1191_v55 = vmov 0.0  }
  0x37   :  { %v937_v5 = vpack.i.bf16 %v1258_v4, %v1254_v2  ;;  %v1270_v7 = vand.u32 127, %v54_v6  ;;  %372 = vmatprep.mubr.f32.mxu0 %v1191_v55  ;;  %443 = vmatprep.mubr.f32.mxu1 %v1191_v55  ;;  %s1193_s22 = smov [#allocation8]  }
  0x38   :  { %933 = vrot.lane.b32.xlu1 %v932_v3, %s1187_s19  ;;  %923 = vrot.lane.b32.xlu0 %v932_v3, %s1188_s20  ;;  %s818_s23 = sshll.u32 %s1193_s22, 4  ;;  %s819_s23 = int_to_ptr.vmem [resolvable:$true] %s818_s23 }
  0x39   :  { %v1273_v8 = vadd.s32 384, %v1270_v7  ;;  %v1276_v9 = vadd.s32 128, %v1270_v7  ;;  %v1279_v10 = vadd.s32 256, %v1270_v7  ;;  %v63_v16 = vand.u32 15, %v1270_v7  ;;  %s1156_s24 = scalar_lea.vmem %s819_s23, 512  ;;  %p1161_p11 = scmp.lt.s32.totalorder %s819_s23, %s819_s23 }
  0x3a   :  { %vm193_vm0 = vcmp.lt.s32.totalorder %v1270_v7, 127  ;;  %vm180_vm1 = vcmp.lt.s32.totalorder %v1270_v7, 1  ;;  %v111_v62 = vand.u32 255, %v1270_v7  ;;  %vm214_vm10 = vcmp.lt.s32.totalorder %v1270_v7, 16  ;;  %p1157_p10 = scmp.ne.s32.totalorder %s819_s23, %s1156_s24  ;;  %p1162_p12 = scmp.lt.s32.totalorder %s1156_s24, %s1156_s24 }
  0x3b   :  { %v84_v13 = vand.u32 15, %v1273_v8  ;;  %v70_v14 = vand.u32 15, %v1276_v9  ;;  %v77_v15 = vand.u32 15, %v1279_v10  ;;  %vm1303_vm5 = vcmp.eq.s32.totalorder %v63_v16, 0 }
  0x3c   :  { %938 = vrot.lane.b32.xlu1 %v937_v5, %s1187_s19  ;;  %928 = vrot.lane.b32.xlu0 %v937_v5, %s1188_s20  ;;  %vm1349_vm8 = vcmp.eq.s32.totalorder %v63_v16, 15  ;;  %v125_v63 = vand.u32 255, %v1279_v10  ;;  %vm1817_vm11 = vcmp.lt.s32.totalorder %v1270_v7, 112  ;;  %vm1405_vm12 = vcmp.lt.s32.totalorder %v111_v62, 16  ;;  %p1163_p13 = por %p1162_p12, %p1161_p11 }
  0x3d   :  { %vm1287_vm2 = vcmp.eq.s32.totalorder %v84_v13, 0  ;;  %vm1291_vm3 = vcmp.eq.s32.totalorder %v70_v14, 0  ;;  %vm1299_vm4 = vcmp.eq.s32.totalorder %v77_v15, 0  ;;  %vm1341_vm6 = vcmp.eq.s32.totalorder %v77_v15, 15 }
  0x3e   :  { %vm1345_vm7 = vcmp.eq.s32.totalorder %v84_v13, 15  ;;  %vm1353_vm9 = vcmp.eq.s32.totalorder %v70_v14, 15  ;;  %vm1409_vm13 = vcmp.lt.s32.totalorder %v125_v63, 16  ;;  %p1164_p0 = pnand %p1163_p13, %p1157_p10 }
  0x40   :  { %948 = vrot.lane.b32.xlu1 %v937_v5, %s1189_s2  ;;  %943 = vrot.lane.b32.xlu0 %v932_v3, %s1189_s2 }
  0x44   :  { %958 = vrot.lane.b32.xlu1 %v937_v5, %s1190_s21  ;;  %953 = vrot.lane.b32.xlu0 %v932_v3, %s1190_s21 }
  0xaa   :  { %v934_v11 = vpop.permute.xlu1 %933  ;;  %v924_v12 = vpop.permute.xlu0 %923 }
  0xab   :  { %v936_v17 = vunpack.i.h.bf16 %v934_v11  ;;  %v935_v18 = vunpack.i.l.bf16 %v934_v11  ;;  %v926_v19 = vunpack.i.h.bf16 %v924_v12  ;;  %v925_v20 = vunpack.i.l.bf16 %v924_v12 }
  0xad   :  { %v196_v29 = vsel %vm193_vm0, %v935_v18, %v936_v17  ;;  %v183_v30 = vsel %vm180_vm1, %v925_v20, %v926_v19 }
  0xae   :  { %v939_v21 = vpop.permute.xlu1 %938  ;;  %v929_v22 = vpop.permute.xlu0 %928 }
  0xaf   :  { %v941_v25 = vunpack.i.h.bf16 %v939_v21  ;;  %v940_v26 = vunpack.i.l.bf16 %v939_v21  ;;  %v931_v27 = vunpack.i.h.bf16 %v929_v22  ;;  %v930_v28 = vunpack.i.l.bf16 %v929_v22 }
  0xb1   :  { %v194_v33 = vsel %vm193_vm0, %v940_v26, %v941_v25  ;;  %v195_v34 = vsel %vm193_vm0, %v936_v17, %v940_v26  ;;  %v197_v35 = vsel %vm193_vm0, %v941_v25, %v935_v18  ;;  %v181_v36 = vsel %vm180_vm1, %v930_v28, %v931_v27 }
  0xb2   :  { %v182_v37 = vsel %vm180_vm1, %v926_v19, %v930_v28  ;;  %v184_v38 = vsel %vm180_vm1, %v931_v27, %v925_v20  ;;  %v1321_v39 = vsel %vm1287_vm2, %v197_v35, %v181_v36  ;;  %v1325_v40 = vsel %vm1291_vm3, %v195_v34, %v183_v30  ;;  %v949_v56 = vpop.permute.xlu1 %948  ;;  %v944_v57 = vpop.permute.xlu0 %943 }
  0xb3   :  { %v1329_v41 = vsel %vm1299_vm4, %v194_v33, %v182_v37  ;;  %v1333_v42 = vsel %vm1303_vm5, %v196_v29, %v184_v38  ;;  %v1359_v49 = vsel %vm1341_vm6, %v182_v37, %v194_v33  ;;  %v1363_v50 = vsel %vm1345_vm7, %v181_v36, %v197_v35 }
  0xb4   :  { %v967_v43 = vpack.i.bf16 %v1321_v39, %v1329_v41  ;;  %v962_v44 = vpack.i.bf16 %v1325_v40, %v1333_v42  ;;  %v1367_v51 = vsel %vm1349_vm8, %v184_v38, %v196_v29  ;;  %v1371_v52 = vsel %vm1353_vm9, %v183_v30, %v195_v34 }
  0xb5   :  { %v987_v53 = vpack.i.bf16 %v1363_v50, %v1359_v49  ;;  %v982_v54 = vpack.i.bf16 %v1371_v52, %v1367_v51  ;;  %v946_v60 = vunpack.i.h.bf16 %v944_v57  ;;  %v945_v61 = vunpack.i.l.bf16 %v944_v57 }
  0xb6   :  { %968 = vrot.lane.b32.xlu1 %v967_v43, %s1189_s2  ;;  %963 = vrot.lane.b32.xlu0 %v962_v44, %s1189_s2  ;;  %v1385_v58 = vpop.permute.xlu1 %958  ;;  %v1387_v59 = vpop.permute.xlu0 %953  ;;  %v951_v3 = vunpack.i.h.bf16 %v949_v56  ;;  %v950_v5 = vunpack.i.l.bf16 %v949_v56 }
  0xb7   :  { %v961_v6 = vunpack.i.h.bf16 %v1385_v58  ;;  %v960_v11 = vunpack.i.l.bf16 %v1385_v58  ;;  %v956_v12 = vunpack.i.h.bf16 %v1387_v59  ;;  %v955_v13 = vunpack.i.l.bf16 %v1387_v59 }
  0xb8   :  { %v1399_v19 = vsel %vm214_vm10, %v945_v61, %v946_v60  ;;  %v1403_v20 = vsel %vm214_vm10, %v950_v5, %v951_v3  ;;  %v251_v27 = vsel %vm214_vm10, %v951_v3, %v945_v61  ;;  %v249_v28 = vsel %vm214_vm10, %v946_v60, %v950_v5 }
  0xb9   :  { %v1435_v35 = vsel %vm1817_vm11, %v955_v13, %v956_v12  ;;  %v1443_v36 = vsel %vm1817_vm11, %v960_v11, %v961_v6 }
  0xba   :  { %978 = vrot.lane.b32.xlu1 %v967_v43, %s1190_s21  ;;  %973 = vrot.lane.b32.xlu0 %v962_v44, %s1190_s21  ;;  %v264_v63 = vsel %vm1405_vm12, %v1435_v35, %v251_v27  ;;  %v266_v5 = vsel %vm1409_vm13, %v1443_v36, %v249_v28 }
  0xbe   :  { %988 = vrot.lane.b32.xlu1 %v987_v53, %s1189_s2  ;;  %983 = vrot.lane.b32.xlu0 %v982_v54, %s1189_s2 }
  0xc2   :  { %998 = vrot.lane.b32.xlu1 %v987_v53, %s1190_s21  ;;  %993 = vrot.lane.b32.xlu0 %v982_v54, %s1190_s21 }
 0x128   :  { %v969_v14 = vpop.permute.xlu1 %968  ;;  %v964_v15 = vpop.permute.xlu0 %963 }
 0x129   :  { %v971_v16 = vunpack.i.h.bf16 %v969_v14  ;;  %v970_v17 = vunpack.i.l.bf16 %v969_v14  ;;  %v966_v18 = vunpack.i.h.bf16 %v964_v15  ;;  %v965_v10 = vunpack.i.l.bf16 %v964_v15 }
 0x12b   :  { %v1415_v25 = vsel %vm214_vm10, %v965_v10, %v966_v18  ;;  %v1419_v26 = vsel %vm214_vm10, %v970_v17, %v971_v16  ;;  %v218_v53 = vsel %vm214_vm10, %v971_v16, %v965_v10  ;;  %v216_v56 = vsel %vm214_vm10, %v966_v18, %v970_v17 }
 0x12c   :  { %v979_v29 = vpop.permute.xlu1 %978  ;;  %v974_v30 = vpop.permute.xlu0 %973  ;;  %v832_v33 = vpack.c.bf16 %v1399_v19, %v1415_v25  ;;  %v852_v34 = vpack.c.bf16 %v1403_v20, %v1419_v26 }
 0x12d   :  { %v981_v37 = vunpack.i.h.bf16 %v979_v29  ;;  %v980_v38 = vunpack.i.l.bf16 %v979_v29  ;;  %v976_v43 = vunpack.i.h.bf16 %v974_v30  ;;  %v975_v44 = vunpack.i.l.bf16 %v974_v30 }
 0x12e   :  { %833 = vmatprep.subr.bf16.mxu0 %v832_v33  ;;  %853 = vmatprep.subr.bf16.mxu1 %v852_v34  ;;  %v118_v30 = vand.u32 255, %v1276_v9  ;;  %v132_v33 = vand.u32 255, %v1273_v8 }
 0x12f   :  { %v1449_v54 = vsel %vm1817_vm11, %v975_v44, %v976_v43  ;;  %v1455_v57 = vsel %vm1817_vm11, %v980_v38, %v981_v37 }
 0x130   :  { %v989_v60 = vpop.permute.xlu1 %988  ;;  %v984_v61 = vpop.permute.xlu0 %983  ;;  %v232_v62 = vsel %vm1405_vm12, %v1449_v54, %v218_v53  ;;  %v234_v3 = vsel %vm1409_vm13, %v1455_v57, %v216_v56  ;;  %vm1493_vm14 = vcmp.ge.s32.totalorder %v118_v30, 240  ;;  %vm1497_vm15 = vcmp.ge.s32.totalorder %v132_v33, 240  ;;  %v171_v33 = vld [vmem:[#allocation5] sm:$0xff] }
 0x131   :  { %v991_v14 = vunpack.i.h.bf16 %v989_v60  ;;  %v990_v15 = vunpack.i.l.bf16 %v989_v60  ;;  %v986_v16 = vunpack.i.h.bf16 %v984_v61  ;;  %v985_v17 = vunpack.i.l.bf16 %v984_v61 }
 0x132   :  { %v834_v18 = vpack.c.bf16 %v264_v63, %v232_v62  ;;  %v854_v10 = vpack.c.bf16 %v266_v5, %v234_v3  ;;  %v231_v5 = vsel %vm1817_vm11, %v981_v37, %v975_v44  ;;  %v261_v37 = vsel %vm1817_vm11, %v956_v12, %v960_v11 }
 0x133   :  { %v282_v29 = vsel %vm214_vm10, %v985_v17, %v986_v16  ;;  %v280_v27 = vsel %vm214_vm10, %v990_v15, %v991_v14  ;;  %v281_v3 = vsel %vm214_vm10, %v986_v16, %v990_v15  ;;  %v283_v8 = vsel %vm214_vm10, %v991_v14, %v985_v17 }
 0x134   :  { %835 = vmatpush1.bf16.msra.mxu0 %v834_v18  ;;  %855 = vmatpush1.bf16.msra.mxu1 %v854_v10  ;;  %v999_v34 = vpop.permute.xlu1 %998  ;;  %v994_v28 = vpop.permute.xlu0 %993  ;;  %v836_v53 = vpack.c.bf16 %v1325_v40, %v282_v29  ;;  %v856_v56 = vpack.c.bf16 %v1321_v39, %v280_v27  ;;  %v229_v39 = vsel %vm1817_vm11, %v976_v43, %v980_v38  ;;  %v1192_v10 = vmov 1.0  }
 0x135   :  { %v1001_v60 = vunpack.i.h.bf16 %v999_v34  ;;  %v1000_v61 = vunpack.i.l.bf16 %v999_v34  ;;  %v996_v62 = vunpack.i.h.bf16 %v994_v28  ;;  %v995_v63 = vunpack.i.l.bf16 %v994_v28 }
 0x136   :  { %837 = vmatprep.subr.bf16.mxu0 %v836_v53  ;;  %857 = vmatprep.subr.bf16.mxu1 %v856_v56  ;;  %v263_v43 = vsel %vm1817_vm11, %v961_v6, %v955_v13  ;;  %v840_v44 = vpack.c.bf16 %v1371_v52, %v1252_v1  ;;  %v239_v11 = vsel %vm1497_vm15, %v1419_v26, %v231_v5 }
 0x137   :  { %v292_v9 = vsel %vm1817_vm11, %v1000_v61, %v1001_v60  ;;  %v294_v40 = vsel %vm1817_vm11, %v995_v63, %v996_v62  ;;  %v293_v58 = vsel %vm1817_vm11, %v996_v62, %v1000_v61  ;;  %v295_v59 = vsel %vm1817_vm11, %v1001_v60, %v995_v63 }
 0x138   :  { %v296_v18 = vsel %vm1405_vm12, %v294_v40, %v283_v8  ;;  %v298_v15 = vsel %vm1409_vm13, %v292_v9, %v281_v3  ;;  %v271_v52 = vsel %vm1497_vm15, %v1403_v20, %v263_v43  ;;  %v842_v6 = vpack.c.bf16 %v1367_v51, %v1250_v0 }
 0x139   :  { %v838_v17 = vpack.c.bf16 %v1333_v42, %v296_v18  ;;  %v858_v38 = vpack.c.bf16 %v1329_v41, %v298_v15  ;;  %v860_v41 = vpack.c.bf16 %v1363_v50, %v1258_v4  ;;  %v237_v42 = vsel %vm1493_vm14, %v1415_v25, %v229_v39 }
 0x13a   :  { %v269_v50 = vsel %vm1493_vm14, %v1399_v19, %v261_v37  ;;  %v862_v12 = vpack.c.bf16 %v1359_v49, %v1254_v2  ;;  %v864_v25 = vpack.c.bf16 %v271_v52, %v239_v11  ;;  %v301_v26 = vsel %vm1493_vm14, %v282_v29, %v293_v58 }
 0x13b   :  { %839 = vmatpush1.bf16.msra.mxu0 %v838_v17  ;;  %859 = vmatpush1.bf16.msra.mxu1 %v858_v38  ;;  %v844_v13 = vpack.c.bf16 %v269_v50, %v237_v42  ;;  %v303_v19 = vsel %vm1497_vm15, %v280_v27, %v295_v59  ;;  %v846_v20 = vpack.c.bf16 %v1435_v35, %v1449_v54  ;;  %vm304_vm11 = vcmask 654336  }
 0x13c   :  { %841 = vmatprep.subr.bf16.mxu0 %v840_v44  ;;  %861 = vmatprep.subr.bf16.mxu1 %v860_v41  ;;  %v866_v51 = vpack.c.bf16 %v1443_v36, %v1455_v57  ;;  %v848_v49 = vpack.c.bf16 %v1192_v10, %v301_v26  ;;  %v868_v30 = vpack.c.bf16 %v1192_v10, %v303_v19 }
 0x13d   :  { %v850_v29 = vpack.c.bf16 %v1192_v10, %v294_v40  ;;  %v870_v27 = vpack.c.bf16 %v1192_v10, %v292_v9 }
 0x13f   :  { %843 = vmatpush1.bf16.msra.mxu0 %v842_v6  ;;  %863 = vmatpush1.bf16.msra.mxu1 %v862_v12 }
 0x140   :  { %845 = vmatprep.subr.bf16.mxu0 %v844_v13  ;;  %865 = vmatprep.subr.bf16.mxu1 %v864_v25 }
 0x143   :  { %847 = vmatpush1.bf16.msra.mxu0 %v846_v20  ;;  %867 = vmatpush1.bf16.msra.mxu1 %v866_v51 }
 0x144   :  { %849 = vmatprep.subr.bf16.mxu0 %v848_v49  ;;  %869 = vmatprep.subr.bf16.mxu1 %v868_v30 }
 0x147   :  { %851 = vmatpush1.bf16.msra.mxu0 %v850_v29  ;;  %871 = vmatpush1.bf16.msra.mxu1 %v870_v27 }
 0x14a   :  { %828 = vmatmul.mubr.msk.f32.vlgmr.msra.gmra.mrb[0].mxu0 %vm304_vm11, %v171_v33  ;;  %829 = vmatmul.mubr.msk.f32.vlgmr.msra.gmra.mrb[0].mxu1 %vm304_vm11, %v171_v33 }
 0x14b   :  { %688 = vmatprep.mubr.f32.mxu0 %v1191_v55  ;;  %759 = vmatprep.mubr.f32.mxu1 %v1191_v55 }
 0x21d   :  { %v374_v35 = vpop.f32.mrb[0].mxu0  ;;  %v445_v36 = vpop.f32.mrb[0].mxu1 }
 0x21e   :  { %v376_v54 = vpop.f32.mrb[1].mxu0  ;;  %v447_v57 = vpop.f32.mrb[1].mxu1  ;;  %v454_v34 = vmul.f32 %v374_v35, %v374_v35  ;;  %v473_v28 = vmul.f32 %v445_v36, %v445_v36 }
 0x21f   :  { %v469_v53 = vadd.f32 %v447_v57, %v445_v36  ;;  %v450_v56 = vadd.f32 %v376_v54, %v374_v35  ;;  %v455_v60 = vmul.f32 %v376_v54, %v376_v54  ;;  %v474_v61 = vmul.f32 %v447_v57, %v447_v57 }
 0x221   :  { %470 = vadd.xlane.f32.xlu1 %v469_v53  ;;  %451 = vadd.xlane.f32.xlu0 %v450_v56  ;;  %v456_v62 = vadd.f32 %v455_v60, %v454_v34  ;;  %v475_v63 = vadd.f32 %v474_v61, %v473_v28 }
 0x225   :  { %457 = vadd.xlane.f32.xlu0 %v456_v62 }
 0x229   :  { %476 = vadd.xlane.f32.xlu0 %v475_v63 }
 0x2ae   :  { %v452_v3 = vpop.xlane.xlu0 %451  ;;  %v471_v9 = vpop.xlane.xlu1 %470 }
 0x2af   :  { %v453_v8 = vmul.f32 0.00390625, %v452_v3  ;;  %v472_v40 = vmul.f32 0.00390625, %v471_v9 }
 0x2b1   :  { %v460_v39 = vmul.f32 %v453_v8, %v453_v8  ;;  %v479_v15 = vmul.f32 %v472_v40, %v472_v40  ;;  %v463_v11 = vsub.f32 %v374_v35, %v453_v8  ;;  %v464_v58 = vsub.f32 %v376_v54, %v453_v8 }
 0x2b2   :  { %v458_v55 = vpop.xlane.xlu0 %457  ;;  %v482_v6 = vsub.f32 %v445_v36, %v472_v40  ;;  %v483_v12 = vsub.f32 %v447_v57, %v472_v40 }
 0x2b3   :  { %v459_v5 = vmul.f32 0.00390625, %v458_v55 }
 0x2b5   :  { %v461_v18 = vsub.f32 %v459_v5, %v460_v39 }
 0x2b6   :  { %v477_v17 = vpop.xlane.xlu0 %476 }
 0x2b7   :  { %v462_v38 = vmax.f32 %v461_v18, 0.0  ;;  %v478_v37 = vmul.f32 0.00390625, %v477_v17 }
 0x2b9   :  { %v465_v43 = vadd.f32 1e-05, %v462_v38  ;;  %v480_v44 = vsub.f32 %v478_v37, %v479_v15 }
 0x2bb   :  { %1082 = vrsqrt.f32 %v465_v43  ;;  %v481_v41 = vmax.f32 %v480_v44, 0.0 }
 0x2bd   :  { %v484_v42 = vadd.f32 1e-05, %v481_v41 }
 0x2bf   :  { %1084 = vrsqrt.f32 %v484_v42 }
 0x2c5   :  { %v1083_v59 = vpop.eup %1082 }
 0x2c6   :  { %v1555_v50 = vmul.f32 %v1083_v59, %v463_v11  ;;  %v1557_v52 = vmul.f32 %v1083_v59, %v464_v58 }
 0x2c8   :  { %v488_v13 = vmax.f32 %v1555_v50, 0.0  ;;  %v489_v25 = vmax.f32 %v1557_v52, 0.0 }
 0x2c9   :  { %v1085_v26 = vpop.eup %1084 }
 0x2ca   :  { %v1561_v19 = vmul.f32 %v1085_v26, %v482_v6  ;;  %v1563_v20 = vmul.f32 %v1085_v26, %v483_v12  ;;  %v1002_v51 = vpack.i.bf16 %v489_v25, %v488_v13 }
 0x2cc   :  { %v490_v49 = vmax.f32 %v1561_v19, 0.0  ;;  %v491_v30 = vmax.f32 %v1563_v20, 0.0  ;;  %1003 = vrot.lane.b32.xlu1 %v1002_v51, %s1188_s20 }
 0x2ce   :  { %v1007_v29 = vpack.i.bf16 %v491_v30, %v490_v49 }
 0x2d0   :  { %1013 = vrot.lane.b32.xlu1 %v1002_v51, %s1187_s19  ;;  %1008 = vrot.lane.b32.xlu0 %v1007_v29, %s1188_s20 }
 0x2d4   :  { %1018 = vrot.lane.b32.xlu1 %v1007_v29, %s1187_s19  ;;  %1023 = vrot.lane.b32.xlu0 %v1002_v51, %s1189_s2 }
 0x2d8   :  { %1028 = vrot.lane.b32.xlu1 %v1007_v29, %s1189_s2  ;;  %1033 = vrot.lane.b32.xlu0 %v1002_v51, %s1190_s21 }
 0x2dc   :  { %1038 = vrot.lane.b32.xlu1 %v1007_v29, %s1190_s21 }
 0x33e   :  { %v1004_v27 = vpop.permute.xlu1 %1003 }
 0x33f   :  { %v1006_v36 = vunpack.i.h.bf16 %v1004_v27  ;;  %v1005_v54 = vunpack.i.l.bf16 %v1004_v27 }
 0x341   :  { %v503_v62 = vsel %vm180_vm1, %v1005_v54, %v1006_v36 }
 0x342   :  { %v1014_v33 = vpop.permute.xlu1 %1013  ;;  %v1009_v35 = vpop.permute.xlu0 %1008 }
 0x343   :  { %v1016_v57 = vunpack.i.h.bf16 %v1014_v33  ;;  %v1015_v34 = vunpack.i.l.bf16 %v1014_v33  ;;  %v1011_v28 = vunpack.i.h.bf16 %v1009_v35  ;;  %v1010_v53 = vunpack.i.l.bf16 %v1009_v35 }
 0x345   :  { %v515_v63 = vsel %vm193_vm0, %v1015_v34, %v1016_v57  ;;  %v504_v3 = vsel %vm180_vm1, %v1011_v28, %v1005_v54  ;;  %v501_v8 = vsel %vm180_vm1, %v1010_v53, %v1011_v28  ;;  %v502_v9 = vsel %vm180_vm1, %v1006_v36, %v1010_v53 }
 0x346   :  { %v1019_v56 = vpop.permute.xlu1 %1018  ;;  %v1613_v17 = vsel %vm1303_vm5, %v515_v63, %v504_v3  ;;  %v1637_v37 = vsel %vm1349_vm8, %v504_v3, %v515_v63  ;;  %v1024_v46 = vpop.permute.xlu0 %1023 }
 0x347   :  { %v1021_v60 = vunpack.i.h.bf16 %v1019_v56  ;;  %v1020_v61 = vunpack.i.l.bf16 %v1019_v56  ;;  %v1026_v41 = vunpack.i.h.bf16 %v1024_v46  ;;  %v1025_v42 = vunpack.i.l.bf16 %v1024_v46 }
 0x349   :  { %v516_v55 = vsel %vm193_vm0, %v1021_v60, %v1015_v34  ;;  %v513_v40 = vsel %vm193_vm0, %v1020_v61, %v1021_v60  ;;  %v514_v39 = vsel %vm193_vm0, %v1016_v57, %v1020_v61  ;;  %v1657_v54 = vsel %vm214_vm10, %v1025_v42, %v1026_v41 }
 0x34a   :  { %v1601_v5 = vsel %vm1291_vm3, %v514_v39, %v503_v62  ;;  %v1605_v18 = vsel %vm1299_vm4, %v513_v40, %v502_v9  ;;  %v1609_v15 = vsel %vm1287_vm2, %v516_v55, %v501_v8  ;;  %v1623_v31 = vsel %vm1353_vm9, %v503_v62, %v514_v39  ;;  %v1029_v43 = vpop.permute.xlu1 %1028  ;;  %v1647_v44 = vpop.permute.xlu0 %1033 }
 0x34b   :  { %v1042_v38 = vpack.i.bf16 %v1601_v5, %v1613_v17  ;;  %v1047_v24 = vpack.i.bf16 %v1609_v15, %v1605_v18  ;;  %v1627_v23 = vsel %vm1341_vm6, %v502_v9, %v513_v40  ;;  %v1631_v32 = vsel %vm1345_vm7, %v501_v8, %v516_v55 }
 0x34c   :  { %v1062_v48 = vpack.i.bf16 %v1623_v31, %v1637_v37  ;;  %v1067_v45 = vpack.i.bf16 %v1631_v32, %v1627_v23  ;;  %v1031_v11 = vunpack.i.h.bf16 %v1029_v43  ;;  %v1030_v58 = vunpack.i.l.bf16 %v1029_v43 }
 0x34d   :  { %1043 = vrot.lane.b32.xlu0 %v1042_v38, %s1189_s2  ;;  %1048 = vrot.lane.b32.xlu1 %v1047_v24, %s1189_s2  ;;  %v1036_v59 = vunpack.i.h.bf16 %v1647_v44  ;;  %v1035_v6 = vunpack.i.l.bf16 %v1647_v44  ;;  %vm1842_vm0 = vcmp.lt.s32.totalorder %v1270_v7, 112  ;;  %v880_v22 = vpack.c.bf16 %v1623_v31, %v489_v25 }
 0x34e   :  { %v1649_v47 = vpop.permute.xlu1 %1038  ;;  %v568_v57 = vsel %vm214_vm10, %v1031_v11, %v1025_v42  ;;  %v1671_v53 = vsel %vm214_vm10, %v1030_v58, %v1031_v11  ;;  %vm1843_vm1 = vmmov %vm1842_vm0  ;;  %v566_v39 = vsel %vm214_vm10, %v1026_v41, %v1030_v58  ;;  %v882_v25 = vpack.c.bf16 %v1637_v37, %v488_v13 }
 0x34f   :  { %v1041_v12 = vunpack.i.h.bf16 %v1649_v47  ;;  %v1040_v26 = vunpack.i.l.bf16 %v1649_v47  ;;  %v1679_v56 = vsel %vm1842_vm0, %v1035_v6, %v1036_v59  ;;  %vm1844_vm2 = vmmov %vm1842_vm0  ;;  %v902_v20 = vpack.c.bf16 %v1627_v23, %v490_v49 }
 0x350   :  { %vm1845_vm3 = vmmov %vm1842_vm0  ;;  %v581_v42 = vsel %vm1405_vm12, %v1679_v56, %v568_v57 }
 0x351   :  { %1053 = vrot.lane.b32.xlu0 %v1042_v38, %s1190_s21  ;;  %1058 = vrot.lane.b32.xlu1 %v1047_v24, %s1190_s21  ;;  %v1687_v60 = vsel %vm1843_vm1, %v1040_v26, %v1041_v12  ;;  %vm1846_vm4 = vmmov %vm1842_vm0 }
 0x352   :  { %v583_v58 = vsel %vm1409_vm13, %v1687_v60, %v566_v39  ;;  %vm1847_vm5 = vmmov %vm1842_vm0 }
 0x353   :  { %vm1848_vm6 = vmmov %vm1842_vm0 }
 0x354   :  { %vm1849_vm7 = vmmov %vm1842_vm0 }
 0x355   :  { %1063 = vrot.lane.b32.xlu0 %v1062_v48, %s1189_s2  ;;  %1068 = vrot.lane.b32.xlu1 %v1067_v45, %s1189_s2  ;;  %vm1850_vm8 = vmmov %vm1842_vm0 }
 0x356   :  { %vm1851_vm9 = vmmov %vm1842_vm0 }
 0x357   :  { %v580_v21 = vsel %vm1851_vm9, %v1041_v12, %v1035_v6 }
 0x358   :  { %v588_v31 = vsel %vm1497_vm15, %v1671_v53, %v580_v21 }
 0x359   :  { %1073 = vrot.lane.b32.xlu0 %v1062_v48, %s1190_s21  ;;  %1078 = vrot.lane.b32.xlu1 %v1067_v45, %s1190_s21 }
 0x3bf   :  { %v1044_v51 = vpop.permute.xlu0 %1043  ;;  %v1049_v29 = vpop.permute.xlu1 %1048 }
 0x3c0   :  { %v1046_v27 = vunpack.i.h.bf16 %v1044_v51  ;;  %v1045_v33 = vunpack.i.l.bf16 %v1044_v51  ;;  %v1051_v35 = vunpack.i.h.bf16 %v1049_v29  ;;  %v1050_v36 = vunpack.i.l.bf16 %v1049_v29 }
 0x3c2   :  { %v1663_v34 = vsel %vm214_vm10, %v1045_v33, %v1046_v27  ;;  %v1667_v28 = vsel %vm214_vm10, %v1050_v36, %v1051_v35  ;;  %v536_v38 = vsel %vm214_vm10, %v1051_v35, %v1045_v33  ;;  %v534_v24 = vsel %vm214_vm10, %v1046_v27, %v1050_v36 }
 0x3c3   :  { %v1054_v61 = vpop.permute.xlu0 %1053  ;;  %v1059_v62 = vpop.permute.xlu1 %1058  ;;  %v872_v63 = vpack.c.bf16 %v1657_v54, %v1663_v34  ;;  %v892_v3 = vpack.c.bf16 %v1671_v53, %v1667_v28 }
 0x3c4   :  { %v1056_v8 = vunpack.i.h.bf16 %v1054_v61  ;;  %v1055_v9 = vunpack.i.l.bf16 %v1054_v61  ;;  %v1061_v55 = vunpack.i.h.bf16 %v1059_v62  ;;  %v1060_v40 = vunpack.i.l.bf16 %v1059_v62 }
 0x3c5   :  { %873 = vmatprep.subr.bf16.mxu0 %v872_v63  ;;  %893 = vmatprep.subr.bf16.mxu1 %v892_v3 }
 0x3c6   :  { %v1701_v48 = vsel %vm1844_vm2, %v1055_v9, %v1056_v8  ;;  %v1705_v45 = vsel %vm1845_vm3, %v1060_v40, %v1061_v55 }
 0x3c7   :  { %v1064_v46 = vpop.permute.xlu0 %1063  ;;  %v1069_v43 = vpop.permute.xlu1 %1068  ;;  %v549_v41 = vsel %vm1405_vm12, %v1701_v48, %v536_v38  ;;  %v551_v11 = vsel %vm1409_vm13, %v1705_v45, %v534_v24  ;;  %v886_v19 = vpack.c.bf16 %v1679_v56, %v1701_v48  ;;  %v906_v49 = vpack.c.bf16 %v1687_v60, %v1705_v45 }
 0x3c8   :  { %v1066_v51 = vunpack.i.h.bf16 %v1064_v46  ;;  %v1065_v29 = vunpack.i.l.bf16 %v1064_v46  ;;  %v1071_v27 = vunpack.i.h.bf16 %v1069_v43  ;;  %v1070_v33 = vunpack.i.l.bf16 %v1069_v43 }
 0x3c9   :  { %v874_v35 = vpack.c.bf16 %v581_v42, %v549_v41  ;;  %v894_v36 = vpack.c.bf16 %v583_v58, %v551_v11  ;;  %v546_v58 = vsel %vm1849_vm7, %v1056_v8, %v1060_v40 }
 0x3ca   :  { %v599_v61 = vsel %vm214_vm10, %v1065_v29, %v1066_v51  ;;  %v597_v57 = vsel %vm214_vm10, %v1070_v33, %v1071_v27  ;;  %v600_v41 = vsel %vm214_vm10, %v1071_v27, %v1065_v29  ;;  %v598_v42 = vsel %vm214_vm10, %v1066_v51, %v1070_v33  ;;  %vm1852_vm10 = vmmov %vm1842_vm0 }
 0x3cb   :  { %875 = vmatpush1.bf16.msra.mxu0 %v874_v35  ;;  %895 = vmatpush1.bf16.msra.mxu1 %v894_v36  ;;  %v1074_v62 = vpop.permute.xlu0 %1073  ;;  %v1079_v63 = vpop.permute.xlu1 %1078  ;;  %v876_v3 = vpack.c.bf16 %v1601_v5, %v599_v61  ;;  %v896_v39 = vpack.c.bf16 %v1609_v15, %v597_v57  ;;  %v548_v15 = vsel %vm1848_vm6, %v1061_v55, %v1055_v9 }
 0x3cc   :  { %v1076_v38 = vunpack.i.h.bf16 %v1074_v62  ;;  %v1075_v24 = vunpack.i.l.bf16 %v1074_v62  ;;  %v1081_v46 = vunpack.i.h.bf16 %v1079_v63  ;;  %v1080_v43 = vunpack.i.l.bf16 %v1079_v63 }
 0x3cd   :  { %877 = vmatprep.subr.bf16.mxu0 %v876_v3  ;;  %897 = vmatprep.subr.bf16.mxu1 %v896_v39  ;;  %v578_v9 = vsel %vm1850_vm8, %v1036_v59, %v1040_v26  ;;  %v556_v44 = vsel %vm1497_vm15, %v1667_v28, %v548_v15  ;;  %v492_v59 = vld [vmem:[#allocation7] sm:$0xff] }
 0x3ce   :  { %v611_v11 = vsel %vm1846_vm4, %v1075_v24, %v1076_v38  ;;  %v609_v5 = vsel %vm1847_vm5, %v1080_v43, %v1081_v46  ;;  %v612_v47 = vsel %vm1852_vm10, %v1081_v46, %v1075_v24 }
 0x3cf   :  { %v613_v35 = vsel %vm1405_vm12, %v611_v11, %v600_v41  ;;  %v615_v29 = vsel %vm1409_vm13, %v609_v5, %v598_v42  ;;  %vm1853_vm12 = vmmov %vm1842_vm0  ;;  %v620_v13 = vsel %vm1497_vm15, %v597_v57, %v612_v47  ;;  %v890_v14 = vpack.c.bf16 %v1192_v10, %v611_v11 }
 0x3d0   :  { %v878_v51 = vpack.c.bf16 %v1613_v17, %v613_v35  ;;  %v898_v27 = vpack.c.bf16 %v1605_v18, %v615_v29  ;;  %v900_v18 = vpack.c.bf16 %v1631_v32, %v491_v30  ;;  %v554_v17 = vsel %vm1493_vm14, %v1663_v34, %v546_v58 }
 0x3d1   :  { %v610_v52 = vsel %vm1853_vm12, %v1076_v38, %v1080_v43  ;;  %v586_v30 = vsel %vm1493_vm14, %v1657_v54, %v578_v9  ;;  %v904_v32 = vpack.c.bf16 %v588_v31, %v556_v44  ;;  %v908_v37 = vpack.c.bf16 %v1192_v10, %v620_v13 }
 0x3d2   :  { %879 = vmatpush1.bf16.msra.mxu0 %v878_v51  ;;  %899 = vmatpush1.bf16.msra.mxu1 %v898_v27  ;;  %v884_v7 = vpack.c.bf16 %v586_v30, %v554_v17  ;;  %v618_v50 = vsel %vm1493_vm14, %v599_v61, %v610_v52  ;;  %v910_v16 = vpack.c.bf16 %v1192_v10, %v609_v5 }
 0x3d3   :  { %881 = vmatprep.subr.bf16.mxu0 %v880_v22  ;;  %901 = vmatprep.subr.bf16.mxu1 %v900_v18  ;;  %v888_v23 = vpack.c.bf16 %v1192_v10, %v618_v50 }
 0x3d6   :  { %883 = vmatpush1.bf16.msra.mxu0 %v882_v25  ;;  %903 = vmatpush1.bf16.msra.mxu1 %v902_v20 }
 0x3d7   :  { %885 = vmatprep.subr.bf16.mxu0 %v884_v7  ;;  %905 = vmatprep.subr.bf16.mxu1 %v904_v32 }
 0x3da   :  { %887 = vmatpush1.bf16.msra.mxu0 %v886_v19  ;;  %907 = vmatpush1.bf16.msra.mxu1 %v906_v49 }
 0x3db   :  { %889 = vmatprep.subr.bf16.mxu0 %v888_v23  ;;  %909 = vmatprep.subr.bf16.mxu1 %v908_v37 }
 0x3de   :  { %891 = vmatpush1.bf16.msra.mxu0 %v890_v14  ;;  %911 = vmatpush1.bf16.msra.mxu1 %v910_v16 }
 0x3e1   :  { %830 = vmatmul.mubr.msk.f32.vlgmr.msra.gmra.mrb[2].mxu0 %vm304_vm11, %v492_v59  ;;  %831 = vmatmul.mubr.msk.f32.vlgmr.msra.gmra.mrb[2].mxu1 %vm304_vm11, %v492_v59 }
 0x4b4   :  { %v690_v6 = vpop.f32.mrb[2].mxu0  ;;  %v761_v12 = vpop.f32.mrb[2].mxu1 }
 0x4b5   :  { %v692_v26 = vpop.f32.mrb[3].mxu0  ;;  %v763_v54 = vpop.f32.mrb[3].mxu1  ;;  %v770_v34 = vmul.f32 %v690_v6, %v690_v6  ;;  %v789_v28 = vmul.f32 %v761_v12, %v761_v12 }
 0x4b6   :  { %v771_v53 = vmul.f32 %v692_v26, %v692_v26  ;;  %v790_v56 = vmul.f32 %v763_v54, %v763_v54  ;;  %v766_v60 = vadd.f32 %v692_v26, %v690_v6  ;;  %v785_v8 = vadd.f32 %v763_v54, %v761_v12 }
 0x4b8   :  { %767 = vadd.xlane.f32.xlu0 %v766_v60  ;;  %786 = vadd.xlane.f32.xlu1 %v785_v8  ;;  %v772_v10 = vadd.f32 %v771_v53, %v770_v34  ;;  %v791_v55 = vadd.f32 %v790_v56, %v789_v28 }
 0x4bc   :  { %773 = vadd.xlane.f32.xlu0 %v772_v10 }
 0x4c0   :  { %792 = vadd.xlane.f32.xlu0 %v791_v55 }
 0x545   :  { %v768_v40 = vpop.xlane.xlu0 %767  ;;  %v787_v45 = vpop.xlane.xlu1 %786 }
 0x546   :  { %v769_v48 = vmul.f32 0.00390625, %v768_v40  ;;  %v788_v36 = vmul.f32 0.00390625, %v787_v45 }
 0x548   :  { %v776_v61 = vmul.f32 %v769_v48, %v769_v48  ;;  %v795_v63 = vmul.f32 %v788_v36, %v788_v36  ;;  %v779_v42 = vsub.f32 %v690_v6, %v769_v48  ;;  %v780_v11 = vsub.f32 %v692_v26, %v769_v48 }
 0x549   :  { %v774_v33 = vpop.xlane.xlu0 %773  ;;  %v798_v35 = vsub.f32 %v761_v12, %v788_v36  ;;  %v799_v29 = vsub.f32 %v763_v54, %v788_v36 }
 0x54a   :  { %v775_v57 = vmul.f32 0.00390625, %v774_v33 }
 0x54c   :  { %v777_v62 = vsub.f32 %v775_v57, %v776_v61 }
 0x54d   :  { %v793_v3 = vpop.xlane.xlu0 %792 }
 0x54e   :  { %v778_v39 = vmax.f32 %v777_v62, 0.0  ;;  %v794_v38 = vmul.f32 0.00390625, %v793_v3 }
 0x550   :  { %v781_v24 = vadd.f32 1e-05, %v778_v39  ;;  %v796_v46 = vsub.f32 %v794_v38, %v795_v63 }
 0x552   :  { %1086 = vrsqrt.f32 %v781_v24  ;;  %v797_v43 = vmax.f32 %v796_v46, 0.0 }
 0x554   :  { %v800_v41 = vadd.f32 1e-05, %v797_v43 }
 0x556   :  { %1088 = vrsqrt.f32 %v800_v41 }
 0x55c   :  { %v1087_v5 = vpop.eup %1086 }
 0x55d   :  { %v783_v15 = vmul.f32 %v1087_v5, %v779_v42  ;;  %v784_v58 = vmul.f32 %v1087_v5, %v780_v11 }
 0x55f   :  { %v804_v51 = vadd.f32 %v783_v15, %v1250_v0  ;;  %v805_v27 = vadd.f32 %v784_v58, %v1252_v1 }
 0x560   :  { %v1089_v9 = vpop.eup %1088 }
 0x561   :  { %v802_v21 = vmul.f32 %v1089_v9, %v798_v35  ;;  %v803_v22 = vmul.f32 %v1089_v9, %v799_v29  ;;  %808 = vst [vmem:[#allocation8] sm:$0xff] %v804_v51  ;;  %809 = vst [vmem:[#allocation8 + $0x8] sm:$0xff] %v805_v27 }
 0x563   :  { %v806_v18 = vadd.f32 %v802_v21, %v1254_v2  ;;  %v807_v17 = vadd.f32 %v803_v22, %v1258_v4 }
 0x565   :  { %810 = vst [vmem:[#allocation8 + $0x10] sm:$0xff] %v806_v18  ;;  %811 = vst [vmem:[#allocation8 + $0x18] sm:$0xff] %v807_v17 }
 0x566   :  { %1167 = shalt.err (!%p1164_p0)
}
 0x567   :  { %s1168_s27 = scalar_lea.hbm %s1816_s3, 512 }
 0x568   :  { %p1169_p1 = scmp.ne.s32.totalorder %s1816_s3, %s1168_s27  ;;  %p1172_p2 = scmp.lt.u32.totalorder %s1168_s27, %s1816_s3 }
 0x56a   :  { %p1174_p3 = pnand %p1172_p2, %p1169_p1 }
 0x56c   :  { %1177 = shalt.err (!%p1174_p3)
}
 0x56d   :  { %821 = dma.vmem_to_hbm [thread:$0]  %s819_s23, 512, %s1816_s3, [#allocation4]  }
 0x56e   :  { %1182 = dma.done.wait [#allocation4], 512  }
 0x56f   :  { %1183 = vsyncadd [#allocation4], 4294966784 }
 0x570   :  { %825 = vsyncpa [#allocation3], 1 }
 0x571   :  { %826 = vsyncpa [#allocation6], 1 }
 0x572   :  { %827 = vsyncpa [#allocation4], 1 }

</bundles_post_ra>
